<compile_context>
chip_gen: v7x
topology: tpu7x:2x2x1
jax: 0.10.0
libtpu: 0.0.40
codegen_flags: <defaults>
</compile_context>

<pallas_src>
import jax
import jax.numpy as jnp
from jax import lax
from jax.experimental import pallas as pl
from jax.experimental.pallas import tpu as pltpu

IN_FEATURES = 10
OUT_FEATURES = 3


def linear_kernel(x_ref, w_ref, b_ref, o_ref):
    # x_ref: [tile_b, IN]  (row-major activation tile, batch on sublanes)
    # w_ref: [OUT, IN],  b_ref: [OUT, 1]
    # out:   [OUT, tile_b] (batch on the 128-lane axis -> unmasked lane-dense stores)
    out = lax.dot_general(
        w_ref[...],
        x_ref[...],
        dimension_numbers=(((1,), (1,)), ((), ())),  # contract the IN dims of both
        preferred_element_type=jnp.float32,
    )
    o_ref[...] = (out + b_ref[...]).astype(o_ref.dtype)


def _round_up(n, m):
    return ((n + m - 1) // m) * m


def _default_tile_and_vmem():
    """Per-generation batch tile + scoped-VMEM limit.

    Double-buffered VMEM budget: the row-major x tile lane-pads 10->128 lanes
    (512 B per batch row) and the [3, tile_b] output sublane-pads 3->8
    (32 B per batch element), i.e. ~1.1 KiB per batch element total.
    """
    try:
        kind = jax.devices()[0].device_kind.lower()
    except Exception:  # pragma: no cover - defensive; assume newer chip
        kind = ""
    if "v5 lite" in kind or "v5e" in kind or "v5litepod" in kind:
        return 16384, 32 << 20  # ~17 MiB used, well under 128 MiB physical
    # v6e / v7x (and unknown): ~34 MiB used; keeps headroom on v7x's 64 MiB VMEM.
    return 32768, 48 << 20


def simple_classifier_forward(x, w, b, *, tile_b=None, vmem_limit_bytes=None):
    """x: [B, 10]; w: [3, 10]; b: [3] (PyTorch nn.Linear layouts). Returns [B, 3]."""
    B = x.shape[0]
    default_tile, default_vmem = _default_tile_and_vmem()
    if tile_b is None:
        tile_b = default_tile
    if vmem_limit_bytes is None:
        vmem_limit_bytes = default_vmem

    # Batch maps onto the 128-lane axis of the output block: the tile must be a
    # multiple of 128 and no larger than the (128-padded) batch.
    padded_b128 = _round_up(B, 128)
    tile_b = max(128, (int(tile_b) // 128) * 128)   # enforce lane divisibility
    tile_b = min(tile_b, padded_b128)               # both multiples of 128
    B_pad = _round_up(B, tile_b)

    # Zero-pad the batch only when needed; padded rows produce bias-only output
    # columns that are sliced off below.  No transpose of x is materialized.
    x_p = x if B_pad == B else jnp.pad(x, ((0, B_pad - B), (0, 0)))
    b_2d = b.reshape(OUT_FEATURES, 1)

    out_t = pl.pallas_call(
        linear_kernel,
        out_shape=jax.ShapeDtypeStruct((OUT_FEATURES, B_pad), x.dtype),
        grid=(B_pad // tile_b,),
        in_specs=[
            # Row-major activation tiles stream along the batch grid axis.
            pl.BlockSpec((tile_b, IN_FEATURES), lambda i: (i, 0)),
            # Weights / bias: constant index_map -> DMA'd once, VMEM-resident.
            pl.BlockSpec((OUT_FEATURES, IN_FEATURES), lambda i: (0, 0)),
            pl.BlockSpec((OUT_FEATURES, 1), lambda i: (0, 0)),
        ],
        out_specs=pl.BlockSpec((OUT_FEATURES, tile_b), lambda i: (0, i)),
        compiler_params=pltpu.CompilerParams(
            dimension_semantics=("parallel",),
            vmem_limit_bytes=vmem_limit_bytes,
        ),
    )(x_p, w, b_2d)

    # Drop batch padding; transpose back to the PyTorch [B, OUT] layout.
    # (Consumers that accept class-major [OUT, B] can take out_t[:, :B]
    #  directly and skip this small extra HBM pass.)
    return out_t[:, :B].T


if __name__ == "__main__":
    key = jax.random.PRNGKey(0)
    kx, kw, kb = jax.random.split(key, 3)

    batch = 8
    x = jax.random.normal(kx, (batch, IN_FEATURES), jnp.float32)

    # Deterministic init matching nn.Linear(10, 3) shapes (Kaiming-uniform-ish scale).
    lim = IN_FEATURES ** -0.5
    w = jax.random.uniform(kw, (OUT_FEATURES, IN_FEATURES), jnp.float32, -lim, lim)
    b = jax.random.uniform(kb, (OUT_FEATURES,), jnp.float32, -lim, lim)

    y = simple_classifier_forward(x, w, b)
    jax.block_until_ready(y)

    # Pure-JAX reference (same math as the PyTorch forward: x @ W.T + b).
    ref = x @ w.T + b
    assert y.shape == (batch, OUT_FEATURES)
    assert jnp.allclose(y, ref, atol=1e-5, rtol=1e-5)

    # Extra correctness check: non-multiple batch with a small explicit tile to
    # exercise batch padding and a multi-step grid.
    batch2 = 300
    x2 = jax.random.normal(kx, (batch2, IN_FEATURES), jnp.float32)
    y2 = simple_classifier_forward(x2, w, b, tile_b=128)
    jax.block_until_ready(y2)
    assert y2.shape == (batch2, OUT_FEATURES)
    assert jnp.allclose(y2, x2 @ w.T + b, atol=1e-5, rtol=1e-5)

    print("KERNEL_OK")
</pallas_src>

<mosaic_0001>
module attributes {stable_mosaic.version = 11 : i64} {
  func.func @linear_kernel(%arg0: i32, %arg1: memref<128x10xf32, #tpu.memory_space<vmem>>, %arg2: memref<3x10xf32, #tpu.memory_space<vmem>>, %arg3: memref<3x1xf32, #tpu.memory_space<vmem>>, %arg4: memref<3x128xf32, #tpu.memory_space<vmem>>) attributes {dimension_semantics = [#tpu.dimension_semantics<parallel>], iteration_bounds = array<i64: 1>, scalar_prefetch = 0 : i64, scratch_operands = 0 : i64, tpu.core_type = #tpu.core_type<tc>, window_params = [{transform_indices = @transform_0, window_bounds = array<i64: 128, 10>}, {pipeline_mode = #tpu.pipeline_mode<synchronous>, transform_indices = @transform_1, window_bounds = array<i64: 3, 10>}, {pipeline_mode = #tpu.pipeline_mode<synchronous>, transform_indices = @transform_2, window_bounds = array<i64: 3, 1>}, {transform_indices = @transform_3, window_bounds = array<i64: 3, 128>}]} {
    %c0 = arith.constant 0 : index
    %c0_0 = arith.constant 0 : index
    %0 = vector.load %arg2[%c0, %c0_0] : memref<3x10xf32, #tpu.memory_space<vmem>>, vector<3x10xf32>
    %c0_1 = arith.constant 0 : index
    %c0_2 = arith.constant 0 : index
    %1 = vector.load %arg1[%c0_1, %c0_2] : memref<128x10xf32, #tpu.memory_space<vmem>>, vector<128x10xf32>
    %cst = arith.constant dense<0.000000e+00> : vector<3x128xf32>
    %2 = tpu.matmul %0, %1, %cst {dimension_numbers = #tpu.dot_dimension_numbers<[1], [1], [0], [0], [0, 0, 1, 0], [], []>} : vector<3x10xf32>, vector<128x10xf32>, vector<3x128xf32> -> vector<3x128xf32>
    %c0_3 = arith.constant 0 : index
    %c0_4 = arith.constant 0 : index
    %3 = vector.load %arg3[%c0_3, %c0_4] : memref<3x1xf32, #tpu.memory_space<vmem>>, vector<3x1xf32>
    %4 = vector.broadcast %3 : vector<3x1xf32> to vector<3x128xf32>
    %5 = arith.addf %2, %4 : vector<3x128xf32>
    %c0_5 = arith.constant 0 : index
    %c0_6 = arith.constant 0 : index
    %6 = vector.load %arg4[%c0_5, %c0_6] : memref<3x128xf32, #tpu.memory_space<vmem>>, vector<3x128xf32>
    tpu.vector_store %arg4[%c0_5, %c0_6], %5 {strides = array<i32>} : memref<3x128xf32, #tpu.memory_space<vmem>>, vector<3x128xf32>,
    return
  }
  func.func @transform_0(%arg0: i32) -> (i32, i32) {
    %c0_i32 = arith.constant 0 : i32
    %c0_i32_0 = arith.constant 0 : i32
    return %arg0, %c0_i32 : i32, i32
  }
  func.func @transform_1(%arg0: i32) -> (i32, i32) {
    %c0_i32 = arith.constant 0 : i32
    %c0_i32_0 = arith.constant 0 : i32
    %c0_i32_1 = arith.constant 0 : i32
    return %c0_i32, %c0_i32_0 : i32, i32
  }
  func.func @transform_2(%arg0: i32) -> (i32, i32) {
    %c0_i32 = arith.constant 0 : i32
    %c0_i32_0 = arith.constant 0 : i32
    %c0_i32_1 = arith.constant 0 : i32
    return %c0_i32, %c0_i32_0 : i32, i32
  }
  func.func @transform_3(%arg0: i32) -> (i32, i32) {
    %c0_i32 = arith.constant 0 : i32
    %c0_i32_0 = arith.constant 0 : i32
    return %c0_i32, %arg0 : i32, i32
  }
}

</mosaic_0001>

<bundles_post_ra>
// kernel: tpu_custom_call.1
= control target key start
LH: loop header
LB: loop body
LE: loop exit
PB: predicated region body
PF: predicated region fallthrough
CT: control target
= control target key end

     0   :  { %vm38_vm0 = vcmask 80896   ;;  %v306_v2 = vmov 0.0|0.0   ;;  %vm307_vm2 = vmmov 0   ;;  %v308_v5 = vmov 0.0   ;;  %s420_s0 = inlined_call_operand.vmem [shape: f32[128,10], index: 0, kind: input, shape index: {}]   ;;  %s421_s1 = inlined_call_operand.vmem [shape: f32[3,10], index: 1, kind: input, shape index: {}]   ;;  %s422_s2 = inlined_call_operand.vmem [shape: f32[3,1], index: 2, kind: input, shape index: {}]   ;;  %s423_s3 = inlined_call_operand.hbm [shape: f32[3,128], index: 3, kind: output, shape index: {}]  }
   0x1   :  { %v16_v0 = vld [vmem:[%s420_s0] sm:$0xff]  ;;  %v17_v1 = vld [vmem:[%s420_s0 + $0x8] sm:$0xff]  ;;  %244 = vmatprep.subr.bf16.mxu0 %v306_v2  ;;  %vm339_vm1 = vmpackc.low %vm38_vm0, %vm38_vm0  ;;  %241 = vmatprep.mubr.msk.f32.mxu0 %vm307_vm2, %v308_v5  ;;  %v309_v6 = vmov 0  }
   0x2   :  { %v245_v3 = vpack.c.bf16 %v17_v1, %v16_v0  ;;  %281 = vset.pattern.permute.xlu0 %v309_v6  ;;  %v18_v7 = vld [vmem:[%s420_s0 + $0x10] sm:$0xff]  ;;  %v19_v8 = vld [vmem:[%s420_s0 + $0x18] sm:$0xff]  ;;  %v32_v9 = vld [vmem:[%s422_s2] sm:$0x7] }
   0x4   :  { %247 = vmatpush3.bf16.xpose.msk.msra.mxu0 %vm339_vm1, %v245_v3 }
   0x5   :  { %248 = vmatprep.subr.bf16.mxu0 %v306_v2 }
   0x6   :  { %8 = vsyncpa [#allocation3], 0  ;;  %v249_v10 = vpack.c.bf16 %v19_v8, %v18_v7  ;;  %35 = vperm.xlu0 %281, %v32_v9   ;;  %v20_v11 = vld [vmem:[%s420_s0 + $0x20] sm:$0xff]  ;;  %v21_v12 = vld [vmem:[%s420_s0 + $0x28] sm:$0xff]  ;;  %s310_s20 = smov [#allocation2]  }
   0x7   :  { %v253_v13 = vpack.c.bf16 %v21_v12, %v20_v11  ;;  %v22_v14 = vld [vmem:[%s420_s0 + $0x30] sm:$0xff]  ;;  %v23_v15 = vld [vmem:[%s420_s0 + $0x38] sm:$0xff]  ;;  %v24_v17 = vld [vmem:[%s420_s0 + $0x40] sm:$0xff]  ;;  %s167_s21 = sshll.u32 %s310_s20, 4  ;;  %s168_s21 = int_to_ptr.vmem [resolvable:$true] %s167_s21 }
   0x8   :  { %v257_v16 = vpack.c.bf16 %v23_v15, %v22_v14  ;;  %v25_v18 = vld [vmem:[%s420_s0 + $0x48] sm:$0xff]  ;;  %v26_v20 = vld [vmem:[%s420_s0 + $0x50] sm:$0xff]  ;;  %v27_v21 = vld [vmem:[%s420_s0 + $0x58] sm:$0xff]  ;;  %s282_s22 = scalar_lea.vmem %s168_s21, 64  ;;  %p287_p1 = scmp.lt.s32.totalorder %s168_s21, %s168_s21 }
   0x9   :  { %v261_v19 = vpack.c.bf16 %v25_v18, %v24_v17  ;;  %v265_v22 = vpack.c.bf16 %v27_v21, %v26_v20  ;;  %v28_v23 = vld [vmem:[%s420_s0 + $0x60] sm:$0xff]  ;;  %v29_v24 = vld [vmem:[%s420_s0 + $0x68] sm:$0xff]  ;;  %v30_v26 = vld [vmem:[%s420_s0 + $0x70] sm:$0xff]  ;;  %p283_p0 = scmp.ne.s32.totalorder %s168_s21, %s282_s22  ;;  %p288_p2 = scmp.lt.s32.totalorder %s282_s22, %s282_s22 }
   0xa   :  { %v269_v25 = vpack.c.bf16 %v29_v24, %v28_v23  ;;  %v31_v27 = vld [vmem:[%s420_s0 + $0x78] sm:$0xff]  ;;  %v15_v29 = vld [vmem:[%s421_s1] sm:$0x7] }
   0xb   :  { %v273_v28 = vpack.c.bf16 %v31_v27, %v30_v26  ;;  %p289_p3 = por %p288_p2, %p287_p1 }
   0xc   :  { %251 = vmatpush3.bf16.xpose.msk.msra.mxu0 %vm339_vm1, %v249_v10 }
   0xd   :  { %252 = vmatprep.subr.bf16.mxu0 %v306_v2  ;;  %p290_p4 = pnand %p289_p3, %p283_p0 }
  0x14   :  { %255 = vmatpush3.bf16.xpose.msk.msra.mxu0 %vm339_vm1, %v253_v13 }
  0x15   :  { %256 = vmatprep.subr.bf16.mxu0 %v306_v2 }
  0x1c   :  { %259 = vmatpush3.bf16.xpose.msk.msra.mxu0 %vm339_vm1, %v257_v16 }
  0x1d   :  { %260 = vmatprep.subr.bf16.mxu0 %v306_v2 }
  0x24   :  { %263 = vmatpush3.bf16.xpose.msk.msra.mxu0 %vm339_vm1, %v261_v19 }
  0x25   :  { %264 = vmatprep.subr.bf16.mxu0 %v306_v2 }
  0x2c   :  { %267 = vmatpush3.bf16.xpose.msk.msra.mxu0 %vm339_vm1, %v265_v22 }
  0x2d   :  { %268 = vmatprep.subr.bf16.mxu0 %v306_v2 }
  0x34   :  { %271 = vmatpush3.bf16.xpose.msk.msra.mxu0 %vm339_vm1, %v269_v25 }
  0x35   :  { %272 = vmatprep.subr.bf16.mxu0 %v306_v2 }
  0x3c   :  { %275 = vmatpush3.bf16.xpose.msk.msra.mxu0 %vm339_vm1, %v273_v28 }
  0x43   :  { %242 = vmatmul.mubr.msk.f32.vlgmr.msra.gmra.mrb[0].mxu0 %vm38_vm0, %v15_v29 }
  0x85   :  { %v36_v30 = vpop.permute.xlu0 %35 }
 0x116   :  { %v156_v31 = vpop.f32.mrb[0].mxu0 }
 0x117   :  { %v157_v32 = vadd.f32 %v156_v31, %v36_v30  ;;  %v243_v33 = vpop.f32.mrb[1].mxu0 }
 0x119   :  { %160 = vst [vmem:[#allocation2] sm:$0x7] %v157_v32 }
 0x11a   :  { %293 = shalt.err (!%p290_p4)
}
 0x11b   :  { %s294_s1 = scalar_lea.hbm %s423_s3, 64 }
 0x11c   :  { %p295_p5 = scmp.ne.s32.totalorder %s423_s3, %s294_s1  ;;  %p298_p6 = scmp.lt.u32.totalorder %s294_s1, %s423_s3 }
 0x11e   :  { %p300_p7 = pnand %p298_p6, %p295_p5 }
 0x120   :  { %303 = shalt.err (!%p300_p7)
}
 0x121   :  { %170 = dma.vmem_to_hbm [thread:$0]  %s168_s21, 64, %s423_s3, [#allocation3]  }
 0x122   :  { %304 = dma.done.wait [#allocation3], 64  }
 0x123   :  { %305 = vsyncadd [#allocation3], 4294967232 }
 0x124   :  { %174 = vsyncpa [#allocation3], 1 }

</bundles_post_ra>
